<compile_context>
chip_gen: v7x
topology: tpu7x:2x2x1
jax: 0.10.0
libtpu: 0.0.40
codegen_flags: <defaults>
</compile_context>

<pallas_src>
import jax
import jax.numpy as jnp
from jax.experimental import pallas as pl
from jax.experimental.pallas import tpu as pltpu


def _round_up(a, b):
    return (a + b - 1) // b * b


def vae_mlp_kernel(x_ref,
                   w1_ref, b1_ref,
                   w2_ref, b2_ref,
                   w3_ref, b3_ref,
                   w4_ref, b4_ref,
                   out_ref):
    """Full encoder->decoder MLP chain for one batch tile, VMEM-resident.

    x / w* are bfloat16 (MXU-friendly); biases and accumulation are float32.
    """
    x = x_ref[...]                                                   # bf16 [tm, text_dim]

    # encoder: Linear(text_dim, 128) + ReLU
    h1 = jnp.dot(x, w1_ref[...], preferred_element_type=jnp.float32) + b1_ref[...]
    h1 = jnp.maximum(h1, 0.0).astype(jnp.bfloat16)

    # encoder: Linear(128, 64)  -> latent z
    z = jnp.dot(h1, w2_ref[...], preferred_element_type=jnp.float32) + b2_ref[...]
    z = z.astype(jnp.bfloat16)

    # decoder: Linear(64, 128) + ReLU
    h2 = jnp.dot(z, w3_ref[...], preferred_element_type=jnp.float32) + b3_ref[...]
    h2 = jnp.maximum(h2, 0.0).astype(jnp.bfloat16)

    # decoder: Linear(128, image_dim_padded)
    out_ref[...] = (jnp.dot(h2, w4_ref[...], preferred_element_type=jnp.float32)
                    + b4_ref[...]).astype(out_ref.dtype)


def text_to_image_vae(x, params, *, max_tile_m=256):
    """x: [batch, text_dim] float32. Returns [batch, image_dim] float32."""
    (w1, b1), (w2, b2), (w3, b3), (w4, b4) = params
    batch, text_dim = x.shape
    h1_dim = w1.shape[1]
    z_dim = w2.shape[1]
    h2_dim = w3.shape[1]
    image_dim = w4.shape[1]

    # --- batch tiling (grid over M; weights stay resident across steps) ---
    tile_m = min(max_tile_m, _round_up(batch, 8))
    padded_batch = _round_up(batch, tile_m)
    grid_m = padded_batch // tile_m

    # --- lane-dense output padding: 784 -> 896 (multiple of 128) ---
    padded_n = _round_up(image_dim, 128)

    # --- dtype / padding prep (outside the kernel, traced once under jit) ---
    x_p = jnp.zeros((padded_batch, text_dim), jnp.bfloat16)
    x_p = x_p.at[:batch, :].set(x.astype(jnp.bfloat16))

    w1b = w1.astype(jnp.bfloat16)
    w2b = w2.astype(jnp.bfloat16)
    w3b = w3.astype(jnp.bfloat16)
    w4b = jnp.zeros((h2_dim, padded_n), jnp.bfloat16)
    w4b = w4b.at[:, :image_dim].set(w4.astype(jnp.bfloat16))
    b4p = jnp.zeros((1, padded_n), jnp.float32)
    b4p = b4p.at[:, :image_dim].set(b4.astype(jnp.float32))

    # Weight/bias specs return a constant block index -> fetched once,
    # VMEM-resident for the whole batch loop. Only x / out tiles move.
    const = lambda shape: pl.BlockSpec(shape, lambda i: tuple(0 for _ in shape))

    out = pl.pallas_call(
        vae_mlp_kernel,
        out_shape=jax.ShapeDtypeStruct((padded_batch, padded_n), jnp.float32),
        grid_spec=pltpu.PrefetchScalarGridSpec(
            num_scalar_prefetch=0,
            grid=(grid_m,),
            in_specs=[
                pl.BlockSpec((tile_m, text_dim), lambda i: (i, 0)),
                const((text_dim, h1_dim)), const((1, h1_dim)),
                const((h1_dim, z_dim)),    const((1, z_dim)),
                const((z_dim, h2_dim)),    const((1, h2_dim)),
                const((h2_dim, padded_n)), const((1, padded_n)),
            ],
            out_specs=pl.BlockSpec((tile_m, padded_n), lambda i: (i, 0)),
        ),
        compiler_params=pltpu.CompilerParams(
            # batch tiles are independent -> shardable across v7x's 2 TCs
            dimension_semantics=("parallel",),
        ),
    )(x_p, w1b, b1, w2b, b2, w3b, b3, w4b, b4p)

    return out[:batch, :image_dim]


def init_params(key, text_dim, image_dim):
    """Deterministic init matching PyTorch Linear shapes (stored as [in, out])."""
    dims = [(text_dim, 128), (128, 64), (64, 128), (128, image_dim)]
    params = []
    for (fan_in, fan_out) in dims:
        key, kw, kb = jax.random.split(key, 3)
        bound = 1.0 / jnp.sqrt(fan_in)
        w = jax.random.uniform(kw, (fan_in, fan_out), jnp.float32, -bound, bound)
        b = jax.random.uniform(kb, (1, fan_out), jnp.float32, -bound, bound)
        params.append((w, b))
    return params


def reference_forward_f32(x, params):
    (w1, b1), (w2, b2), (w3, b3), (w4, b4) = params
    h = jnp.maximum(x @ w1 + b1, 0.0)
    z = h @ w2 + b2
    h = jnp.maximum(z @ w3 + b3, 0.0)
    return h @ w4 + b4


def reference_forward_bf16(x, params):
    """Same bf16-weight / f32-accumulate recipe as the kernel."""
    (w1, b1), (w2, b2), (w3, b3), (w4, b4) = params
    bf, f32 = jnp.bfloat16, jnp.float32
    xb = x.astype(bf)
    h1 = jnp.maximum(jnp.dot(xb, w1.astype(bf), preferred_element_type=f32) + b1, 0.0).astype(bf)
    z = (jnp.dot(h1, w2.astype(bf), preferred_element_type=f32) + b2).astype(bf)
    h2 = jnp.maximum(jnp.dot(z, w3.astype(bf), preferred_element_type=f32) + b3, 0.0).astype(bf)
    return jnp.dot(h2, w4.astype(bf), preferred_element_type=f32) + b4


if __name__ == "__main__":
    text_dim = 128
    image_dim = 784
    batch = 8  # small, sublane-aligned demo batch

    key = jax.random.PRNGKey(0)
    key, kx = jax.random.split(key)
    # The original module is called with a raw string; here we model the text
    # input as an already-embedded [batch, text_dim] float tensor.
    # TODO(synk): text tokenization/embedding has no Pallas equivalent; input is a dense embedding.
    x = jax.random.normal(kx, (batch, text_dim), jnp.float32)

    params = init_params(key, text_dim, image_dim)

    out = text_to_image_vae(x, params)
    out = jax.block_until_ready(out)
    assert out.shape == (batch, image_dim)

    # strict check vs. a reference using the same bf16-weight recipe
    ref_bf16 = reference_forward_bf16(x, params)
    assert jnp.allclose(out, ref_bf16, atol=2e-3, rtol=2e-3), "mismatch vs bf16 reference"

    # loose sanity check vs. the full-f32 reference (bf16 quantization error only)
    ref_f32 = reference_forward_f32(x, params)
    assert jnp.allclose(out, ref_f32, atol=5e-2, rtol=5e-2), "mismatch vs f32 reference"

    print("KERNEL_OK")
</pallas_src>

<mosaic_0001>
module attributes {stable_mosaic.version = 11 : i64} {
  func.func @vae_mlp_kernel(%arg0: i32, %arg1: memref<8x128xbf16, #tpu.memory_space<vmem>>, %arg2: memref<128x128xbf16, #tpu.memory_space<vmem>>, %arg3: memref<1x128xf32, #tpu.memory_space<vmem>>, %arg4: memref<128x64xbf16, #tpu.memory_space<vmem>>, %arg5: memref<1x64xf32, #tpu.memory_space<vmem>>, %arg6: memref<64x128xbf16, #tpu.memory_space<vmem>>, %arg7: memref<1x128xf32, #tpu.memory_space<vmem>>, %arg8: memref<128x896xbf16, #tpu.memory_space<vmem>>, %arg9: memref<1x896xf32, #tpu.memory_space<vmem>>, %arg10: memref<8x896xf32, #tpu.memory_space<vmem>>) attributes {dimension_semantics = [#tpu.dimension_semantics<parallel>], iteration_bounds = array<i64: 1>, scalar_prefetch = 0 : i64, scratch_operands = 0 : i64, tpu.core_type = #tpu.core_type<tc>, window_params = [{transform_indices = @transform_0, window_bounds = array<i64: 8, 128>}, {pipeline_mode = #tpu.pipeline_mode<synchronous>, transform_indices = @transform_1, window_bounds = array<i64: 128, 128>}, {pipeline_mode = #tpu.pipeline_mode<synchronous>, transform_indices = @transform_2, window_bounds = array<i64: 1, 128>}, {pipeline_mode = #tpu.pipeline_mode<synchronous>, transform_indices = @transform_3, window_bounds = array<i64: 128, 64>}, {pipeline_mode = #tpu.pipeline_mode<synchronous>, transform_indices = @transform_4, window_bounds = array<i64: 1, 64>}, {pipeline_mode = #tpu.pipeline_mode<synchronous>, transform_indices = @transform_5, window_bounds = array<i64: 64, 128>}, {pipeline_mode = #tpu.pipeline_mode<synchronous>, transform_indices = @transform_6, window_bounds = array<i64: 1, 128>}, {pipeline_mode = #tpu.pipeline_mode<synchronous>, transform_indices = @transform_7, window_bounds = array<i64: 128, 896>}, {pipeline_mode = #tpu.pipeline_mode<synchronous>, transform_indices = @transform_8, window_bounds = array<i64: 1, 896>}, {transform_indices = @transform_9, window_bounds = array<i64: 8, 896>}]} {
    %c0 = arith.constant 0 : index
    %c0_0 = arith.constant 0 : index
    %0 = vector.load %arg1[%c0, %c0_0] : memref<8x128xbf16, #tpu.memory_space<vmem>>, vector<8x128xbf16>
    %c0_1 = arith.constant 0 : index
    %c0_2 = arith.constant 0 : index
    %1 = vector.load %arg2[%c0_1, %c0_2] : memref<128x128xbf16, #tpu.memory_space<vmem>>, vector<128x128xbf16>
    %cst = arith.constant dense<0.000000e+00> : vector<8x128xf32>
    %2 = tpu.matmul %0, %1, %cst {dimension_numbers = #tpu.dot_dimension_numbers<[1], [0], [0], [1], [0, 0, 1, 1], [], []>} : vector<8x128xbf16>, vector<128x128xbf16>, vector<8x128xf32> -> vector<8x128xf32>
    %c0_3 = arith.constant 0 : index
    %c0_4 = arith.constant 0 : index
    %3 = vector.load %arg3[%c0_3, %c0_4] : memref<1x128xf32, #tpu.memory_space<vmem>>, vector<1x128xf32>
    %4 = vector.broadcast %3 : vector<1x128xf32> to vector<8x128xf32>
    %5 = arith.addf %2, %4 : vector<8x128xf32>
    %cst_5 = arith.constant 0.000000e+00 : f32
    %6 = vector.broadcast %cst_5 : f32 to vector<8x128xf32>
    %7 = arith.maximumf %5, %6 : vector<8x128xf32>
    %8 = arith.truncf %7 : vector<8x128xf32> to vector<8x128xbf16>
    %c0_6 = arith.constant 0 : index
    %c0_7 = arith.constant 0 : index
    %9 = vector.load %arg4[%c0_6, %c0_7] : memref<128x64xbf16, #tpu.memory_space<vmem>>, vector<128x64xbf16>
    %cst_8 = arith.constant dense<0.000000e+00> : vector<8x64xf32>
    %10 = tpu.matmul %8, %9, %cst_8 {dimension_numbers = #tpu.dot_dimension_numbers<[1], [0], [0], [1], [0, 0, 1, 1], [], []>} : vector<8x128xbf16>, vector<128x64xbf16>, vector<8x64xf32> -> vector<8x64xf32>
    %c0_9 = arith.constant 0 : index
    %c0_10 = arith.constant 0 : index
    %11 = vector.load %arg5[%c0_9, %c0_10] : memref<1x64xf32, #tpu.memory_space<vmem>>, vector<1x64xf32>
    %12 = vector.broadcast %11 : vector<1x64xf32> to vector<8x64xf32>
    %13 = arith.addf %10, %12 : vector<8x64xf32>
    %14 = arith.truncf %13 : vector<8x64xf32> to vector<8x64xbf16>
    %c0_11 = arith.constant 0 : index
    %c0_12 = arith.constant 0 : index
    %15 = vector.load %arg6[%c0_11, %c0_12] : memref<64x128xbf16, #tpu.memory_space<vmem>>, vector<64x128xbf16>
    %cst_13 = arith.constant dense<0.000000e+00> : vector<8x128xf32>
    %16 = tpu.matmul %14, %15, %cst_13 {dimension_numbers = #tpu.dot_dimension_numbers<[1], [0], [0], [1], [0, 0, 1, 1], [], []>} : vector<8x64xbf16>, vector<64x128xbf16>, vector<8x128xf32> -> vector<8x128xf32>
    %c0_14 = arith.constant 0 : index
    %c0_15 = arith.constant 0 : index
    %17 = vector.load %arg7[%c0_14, %c0_15] : memref<1x128xf32, #tpu.memory_space<vmem>>, vector<1x128xf32>
    %18 = vector.broadcast %17 : vector<1x128xf32> to vector<8x128xf32>
    %19 = arith.addf %16, %18 : vector<8x128xf32>
    %cst_16 = arith.constant 0.000000e+00 : f32
    %20 = vector.broadcast %cst_16 : f32 to vector<8x128xf32>
    %21 = arith.maximumf %19, %20 : vector<8x128xf32>
    %22 = arith.truncf %21 : vector<8x128xf32> to vector<8x128xbf16>
    %c0_17 = arith.constant 0 : index
    %c0_18 = arith.constant 0 : index
    %23 = vector.load %arg8[%c0_17, %c0_18] : memref<128x896xbf16, #tpu.memory_space<vmem>>, vector<128x896xbf16>
    %cst_19 = arith.constant dense<0.000000e+00> : vector<8x896xf32>
    %24 = tpu.matmul %22, %23, %cst_19 {dimension_numbers = #tpu.dot_dimension_numbers<[1], [0], [0], [1], [0, 0, 1, 1], [], []>} : vector<8x128xbf16>, vector<128x896xbf16>, vector<8x896xf32> -> vector<8x896xf32>
    %c0_20 = arith.constant 0 : index
    %c0_21 = arith.constant 0 : index
    %25 = vector.load %arg9[%c0_20, %c0_21] : memref<1x896xf32, #tpu.memory_space<vmem>>, vector<1x896xf32>
    %26 = vector.broadcast %25 : vector<1x896xf32> to vector<8x896xf32>
    %27 = arith.addf %24, %26 : vector<8x896xf32>
    %c0_22 = arith.constant 0 : index
    %c0_23 = arith.constant 0 : index
    %28 = vector.load %arg10[%c0_22, %c0_23] : memref<8x896xf32, #tpu.memory_space<vmem>>, vector<8x896xf32>
    tpu.vector_store %arg10[%c0_22, %c0_23], %27 {strides = array<i32>} : memref<8x896xf32, #tpu.memory_space<vmem>>, vector<8x896xf32>,
    return
  }
  func.func @transform_0(%arg0: i32) -> (i32, i32) {
    %c0_i32 = arith.constant 0 : i32
    %c0_i32_0 = arith.constant 0 : i32
    return %arg0, %c0_i32 : i32, i32
  }
  func.func @transform_1(%arg0: i32) -> (i32, i32) {
    %c0_i32 = arith.constant 0 : i32
    %c0_i32_0 = arith.constant 0 : i32
    %c0_i32_1 = arith.constant 0 : i32
    return %c0_i32, %c0_i32_0 : i32, i32
  }
  func.func @transform_2(%arg0: i32) -> (i32, i32) {
    %c0_i32 = arith.constant 0 : i32
    %c0_i32_0 = arith.constant 0 : i32
    %c0_i32_1 = arith.constant 0 : i32
    return %c0_i32, %c0_i32_0 : i32, i32
  }
  func.func @transform_3(%arg0: i32) -> (i32, i32) {
    %c0_i32 = arith.constant 0 : i32
    %c0_i32_0 = arith.constant 0 : i32
    %c0_i32_1 = arith.constant 0 : i32
    return %c0_i32, %c0_i32_0 : i32, i32
  }
  func.func @transform_4(%arg0: i32) -> (i32, i32) {
    %c0_i32 = arith.constant 0 : i32
    %c0_i32_0 = arith.constant 0 : i32
    %c0_i32_1 = arith.constant 0 : i32
    return %c0_i32, %c0_i32_0 : i32, i32
  }
  func.func @transform_5(%arg0: i32) -> (i32, i32) {
    %c0_i32 = arith.constant 0 : i32
    %c0_i32_0 = arith.constant 0 : i32
    %c0_i32_1 = arith.constant 0 : i32
    return %c0_i32, %c0_i32_0 : i32, i32
  }
  func.func @transform_6(%arg0: i32) -> (i32, i32) {
    %c0_i32 = arith.constant 0 : i32
    %c0_i32_0 = arith.constant 0 : i32
    %c0_i32_1 = arith.constant 0 : i32
    return %c0_i32, %c0_i32_0 : i32, i32
  }
  func.func @transform_7(%arg0: i32) -> (i32, i32) {
    %c0_i32 = arith.constant 0 : i32
    %c0_i32_0 = arith.constant 0 : i32
    %c0_i32_1 = arith.constant 0 : i32
    return %c0_i32, %c0_i32_0 : i32, i32
  }
  func.func @transform_8(%arg0: i32) -> (i32, i32) {
    %c0_i32 = arith.constant 0 : i32
    %c0_i32_0 = arith.constant 0 : i32
    %c0_i32_1 = arith.constant 0 : i32
    return %c0_i32, %c0_i32_0 : i32, i32
  }
  func.func @transform_9(%arg0: i32) -> (i32, i32) {
    %c0_i32 = arith.constant 0 : i32
    %c0_i32_0 = arith.constant 0 : i32
    return %arg0, %c0_i32 : i32, i32
  }
}

</mosaic_0001>

<bundles_post_ra>
// kernel: tpu_custom_call.1
= control target key start
LH: loop header
LB: loop body
LE: loop exit
PB: predicated region body
PF: predicated region fallthrough
CT: control target
= control target key end

     0   :  { %14 = vsyncpa [#allocation3], 0  ;;  %s1556_s0 = inlined_call_operand.hbm [shape: bf16[8,128], index: 0, kind: input, shape index: {}]   ;;  %s1557_s1 = inlined_call_operand.vmem [shape: bf16[128,128], index: 1, kind: input, shape index: {}]   ;;  %s1558_s2 = inlined_call_operand.hbm [shape: f32[1,128], index: 2, kind: input, shape index: {}]   ;;  %s1559_s3 = inlined_call_operand.vmem [shape: bf16[128,64], index: 3, kind: input, shape index: {}]   ;;  %s1560_s4 = inlined_call_operand.vmem [shape: f32[1,64], index: 4, kind: input, shape index: {}]   ;;  %s1561_s5 = inlined_call_operand.vmem [shape: bf16[64,128], index: 5, kind: input, shape index: {}]   ;;  %s1562_s6 = inlined_call_operand.vmem [shape: f32[1,128], index: 6, kind: input, shape index: {}]   ;;  %s1563_s7 = inlined_call_operand.hbm [shape: bf16[128,896], index: 7, kind: input, shape index: {}]   ;;  %s1564_s8 = inlined_call_operand.vmem [shape: f32[1,896], index: 8, kind: input, shape index: {}]   ;;  %s1565_s9 = inlined_call_operand.hbm [shape: f32[8,896], index: 9, kind: output, shape index: {}]  }
   0x1   :  { %15 = vsyncpa [#allocation6], 0 }
   0x2   :  { %16 = vsyncpa [#allocation4], 0  ;;  %s1344_s30 = smov [#allocation5]   ;;  %s1345_s11 = smov [#allocation2]  }
   0x3   :  { %s35_s10 = sshll.u32 %s1344_s30, 4  ;;  %s23_s12 = sshll.u32 %s1345_s11, 4  ;;  %s36_s10 = int_to_ptr.vmem [resolvable:$true] %s35_s10  ;;  %s24_s12 = int_to_ptr.vmem [resolvable:$true] %s23_s12 }
   0x4   :  { %s1250_s15 = scalar_lea.hbm %s1558_s2, 16 }
   0x5   :  { %p1251_p0 = scmp.ne.s32.totalorder %s1558_s2, %s1250_s15  ;;  %p1254_p1 = scmp.lt.u32.totalorder %s1250_s15, %s1558_s2 }
   0x7   :  { %p1256_p2 = pnand %p1254_p1, %p1251_p0 }
   0x9   :  { %1259 = shalt.err (!%p1256_p2)
}
   0xa   :  { %s1260_s20 = scalar_lea.vmem %s36_s10, 16  ;;  %s1264_s21 = scalar_lea.vmem %s36_s10, 32 }
   0xb   :  { %p1261_p3 = scmp.ne.s32.totalorder %s36_s10, %s1260_s20  ;;  %p1265_p4 = scmp.lt.s32.totalorder %s36_s10, %s36_s10 }
   0xc   :  { %p1266_p5 = scmp.lt.s32.totalorder %s1264_s21, %s1260_s20 }
   0xe   :  { %p1267_p6 = por %p1266_p5, %p1265_p4 }
  0x10   :  { %p1268_p7 = pnand %p1267_p6, %p1261_p3 }
  0x12   :  { %1271 = shalt.err (!%p1268_p7)
}
  0x13   :  { %38 = dma.hbm_to_vmem [thread:$0]  %s1558_s2, 16, %s36_s10, [#allocation6]  }
  0x14   :  { %s1272_s26 = scalar_lea.hbm %s1556_s0, 64 }
  0x15   :  { %p1273_p8 = scmp.ne.s32.totalorder %s1556_s0, %s1272_s26  ;;  %p1276_p9 = scmp.lt.u32.totalorder %s1272_s26, %s1556_s0 }
  0x17   :  { %p1278_p10 = pnand %p1276_p9, %p1273_p8 }
  0x19   :  { %1281 = shalt.err (!%p1278_p10)
}
  0x1a   :  { %s1282_s11 = scalar_lea.vmem %s24_s12, 64  ;;  %p1287_p12 = scmp.lt.s32.totalorder %s24_s12, %s24_s12 }
  0x1b   :  { %p1283_p11 = scmp.ne.s32.totalorder %s24_s12, %s1282_s11  ;;  %p1288_p13 = scmp.lt.s32.totalorder %s1282_s11, %s1282_s11 }
  0x1d   :  { %p1289_p0 = por %p1288_p13, %p1287_p12 }
  0x1f   :  { %p1290_p1 = pnand %p1289_p0, %p1283_p11 }
  0x21   :  { %1293 = shalt.err (!%p1290_p1)
}
  0x22   :  { %26 = dma.hbm_to_vmem [thread:$0]  %s1556_s0, 64, %s24_s12, [#allocation3]  }
  0x23   :  { %s1346_s13 = smov [#allocation7]   ;;  %s1294_s17 = scalar_lea.hbm %s1563_s7, 7168 }
  0x24   :  { %s52_s14 = sshll.u32 %s1346_s13, 4  ;;  %p1295_p2 = scmp.ne.s32.totalorder %s1563_s7, %s1294_s17  ;;  %s53_s14 = int_to_ptr.vmem [resolvable:$true] %s52_s14 }
  0x25   :  { %p1298_p3 = scmp.lt.u32.totalorder %s1294_s17, %s1563_s7 }
  0x27   :  { %p1300_p4 = pnand %p1298_p3, %p1295_p2 }
  0x29   :  { %1303 = shalt.err (!%p1300_p4)
}
  0x2a   :  { %s1304_s22 = scalar_lea.vmem %s53_s14, 7168  ;;  %p1309_p6 = scmp.lt.s32.totalorder %s53_s14, %s53_s14 }
  0x2b   :  { %p1305_p5 = scmp.ne.s32.totalorder %s53_s14, %s1304_s22  ;;  %p1310_p7 = scmp.lt.s32.totalorder %s1304_s22, %s1304_s22 }
  0x2d   :  { %p1311_p8 = por %p1310_p7, %p1309_p6 }
  0x2f   :  { %p1312_p9 = pnand %p1311_p8, %p1305_p5 }
  0x31   :  { %1315 = shalt.err (!%p1312_p9)
}
  0x32   :  { %s1347_s0 = smov 448   ;;  %s1348_s12 = smov 28  }
  0x33   :  { %58 = dma.hbm_to_vmem [thread:$0]  %s1563_s7, 7168, %s53_s14, [#allocation6], %s1347_s0, %s1347_s0, %s1348_s12  }
  0x34   :  { %1338 = dma.done.wait [#allocation3], 64  }
  0x35   :  { %1339 = vsyncadd [#allocation3], 4294967232 }
  0x36   :  { %1340 = dma.done.wait [#allocation6], 7184  }
  0x37   :  { %1341 = vsyncadd [#allocation6], 4294960112  ;;  %v1349_v0 = vmov 0.0   ;;  %vm1350_vm0 = vmmov 0   ;;  %v1150_v1 = vld [vmem:[%s1557_s1] sm:$0xff]   ;;  %v1151_v2 = vld [vmem:[%s1557_s1 + $0x8] sm:$0xff]  }
  0x38   :  { %1069 = vmatprep.subr.bf16.mxu0 %v1349_v0  ;;  %1085 = vmatprep.mubr.msk.bf16.mxu0 %vm1350_vm0, %v1349_v0  ;;  %v1152_v3 = vld [vmem:[%s1557_s1 + $0x10] sm:$0xff]   ;;  %v1158_v4 = vld [vmem:[%s1559_s3] sm:$0xff]   ;;  %v1153_v5 = vld [vmem:[%s1557_s1 + $0x18] sm:$0xff]   ;;  %vm336_vm1 = vcmask 523264  }
  0x39   :  { %1089 = vmatprep.subr.bf16.mxu1 %v1349_v0  ;;  %1105 = vmatprep.mubr.msk.bf16.mxu1 %vm1350_vm0, %v1349_v0  ;;  %v1159_v6 = vld [vmem:[%s1559_s3 + $0x8] sm:$0xff]   ;;  %v1154_v7 = vld [vmem:[%s1557_s1 + $0x20] sm:$0xff]   ;;  %v1160_v8 = vld [vmem:[%s1559_s3 + $0x10] sm:$0xff]  }
  0x3a   :  { %1070 = vmatpush3.bf16.msra.mxu0 %v1150_v1  ;;  %1090 = vmatpush3.bf16.msra.mxu1 %v1158_v4  ;;  %v1155_v9 = vld [vmem:[%s1557_s1 + $0x28] sm:$0xff]   ;;  %v1161_v10 = vld [vmem:[%s1559_s3 + $0x18] sm:$0xff]   ;;  %v1156_v11 = vld [vmem:[%s1557_s1 + $0x30] sm:$0xff]  }
  0x3b   :  { %1071 = vmatprep.subr.bf16.mxu0 %v1349_v0  ;;  %1091 = vmatprep.subr.bf16.mxu1 %v1349_v0  ;;  %v1162_v12 = vld [vmem:[%s1559_s3 + $0x20] sm:$0xff]   ;;  %v1157_v13 = vld [vmem:[%s1557_s1 + $0x38] sm:$0xff]   ;;  %v1163_v14 = vld [vmem:[%s1559_s3 + $0x28] sm:$0xff]  }
  0x3c   :  { %v71_v15 = vld [vmem:[#allocation2] sm:$0xf]  ;;  %v1164_v16 = vld [vmem:[%s1559_s3 + $0x30] sm:$0xff]   ;;  %v1165_v17 = vld [vmem:[%s1559_s3 + $0x38] sm:$0xff]  }
  0x3d   :  { %v1166_v18 = vld [vmem:[%s1561_s5] sm:$0xff]   ;;  %v1167_v19 = vld [vmem:[%s1561_s5 + $0x8] sm:$0xff]   ;;  %v1168_v20 = vld [vmem:[%s1561_s5 + $0x10] sm:$0xff]  }
  0x3e   :  { %1072 = vmatpush3.bf16.msra.mxu0 %v1151_v2  ;;  %1092 = vmatpush3.bf16.msra.mxu1 %v1159_v6  ;;  %v957_v21 = vld [vmem:[#allocation5] ss:$0 sm:$0xff]  ;;  %v1169_v29 = vld [vmem:[%s1561_s5 + $0x18] sm:$0xff]   ;;  %v1172_v31 = vld [vmem:[#allocation7 + $0x4] ss:$28 sps:$4 sm:$0xff]  }
  0x3f   :  { %1073 = vmatprep.subr.bf16.mxu0 %v1349_v0  ;;  %1093 = vmatprep.subr.bf16.mxu1 %v1349_v0  ;;  %v1170_v30 = vld [vmem:[#allocation7] ss:$28 sps:$4 sm:$0xff]   ;;  %v1175_v32 = vld [vmem:[#allocation7 + $0xc] ss:$28 sps:$4 sm:$0xff]   ;;  %v1176_v34 = vld [vmem:[#allocation7 + $0x38] ss:$28 sps:$4 sm:$0xff]  }
  0x40   :  { %v1178_v33 = vld [vmem:[#allocation7 + $0x3c] ss:$28 sps:$4 sm:$0xff]   ;;  %v1184_v35 = vld [vmem:[#allocation7 + $0x74] ss:$28 sps:$4 sm:$0xff]   ;;  %v1190_v37 = vld [vmem:[#allocation7 + $0xac] ss:$28 sps:$4 sm:$0xff]  }
  0x41   :  { %v1182_v36 = vld [vmem:[#allocation7 + $0x70] ss:$28 sps:$4 sm:$0xff]   ;;  %v1188_v38 = vld [vmem:[#allocation7 + $0xa8] ss:$28 sps:$4 sm:$0xff]   ;;  %v1194_v40 = vld [vmem:[#allocation7 + $0xe0] ss:$28 sps:$4 sm:$0xff]  }
  0x42   :  { %1074 = vmatpush3.bf16.msra.mxu0 %v1152_v3  ;;  %1094 = vmatpush3.bf16.msra.mxu1 %v1160_v8  ;;  %v1196_v39 = vld [vmem:[#allocation7 + $0xe4] ss:$28 sps:$4 sm:$0xff]   ;;  %v1202_v41 = vld [vmem:[#allocation7 + $0x11c] ss:$28 sps:$4 sm:$0xff]   ;;  %v1208_v43 = vld [vmem:[#allocation7 + $0x154] ss:$28 sps:$4 sm:$0xff]  }
  0x43   :  { %1075 = vmatprep.subr.bf16.mxu0 %v1349_v0  ;;  %1095 = vmatprep.subr.bf16.mxu1 %v1349_v0  ;;  %v1200_v42 = vld [vmem:[#allocation7 + $0x118] ss:$28 sps:$4 sm:$0xff]   ;;  %v1206_v44 = vld [vmem:[#allocation7 + $0x150] ss:$28 sps:$4 sm:$0xff]   ;;  %v1173_v50 = vld [vmem:[#allocation7 + $0x8] ss:$28 sps:$4 sm:$0xff]  }
  0x44   :  { %v966_v45 = vld [vmem:[%s1560_s4] ss:$0 sm:$0xff]  ;;  %v1181_v53 = vld [vmem:[#allocation7 + $0x44] ss:$28 sps:$4 sm:$0xff]   ;;  %v1193_v57 = vld [vmem:[#allocation7 + $0xb4] ss:$28 sps:$4 sm:$0xff]  }
  0x45   :  { %v1179_v54 = vld [vmem:[#allocation7 + $0x40] ss:$28 sps:$4 sm:$0xff]   ;;  %v1185_v56 = vld [vmem:[#allocation7 + $0x78] ss:$28 sps:$4 sm:$0xff]   ;;  %v1191_v58 = vld [vmem:[#allocation7 + $0xb0] ss:$28 sps:$4 sm:$0xff]  }
  0x46   :  { %1076 = vmatpush3.bf16.msra.mxu0 %v1153_v5  ;;  %1096 = vmatpush3.bf16.msra.mxu1 %v1161_v10  ;;  %v1187_v55 = vld [vmem:[#allocation7 + $0x7c] ss:$28 sps:$4 sm:$0xff]   ;;  %v1199_v59 = vld [vmem:[#allocation7 + $0xec] ss:$28 sps:$4 sm:$0xff]   ;;  %v1205_v61 = vld [vmem:[#allocation7 + $0x124] ss:$28 sps:$4 sm:$0xff]  }
  0x47   :  { %1077 = vmatprep.subr.bf16.mxu0 %v1349_v0  ;;  %1097 = vmatprep.subr.bf16.mxu1 %v1349_v0  ;;  %v1197_v60 = vld [vmem:[#allocation7 + $0xe8] ss:$28 sps:$4 sm:$0xff]   ;;  %v1203_v62 = vld [vmem:[#allocation7 + $0x120] ss:$28 sps:$4 sm:$0xff]   ;;  %v1209_v1 = vld [vmem:[#allocation7 + $0x158] ss:$28 sps:$4 sm:$0xff]  }
  0x48   :  { %v1211_v63 = vld [vmem:[#allocation7 + $0x15c] ss:$28 sps:$4 sm:$0xff]   ;;  %v1214_v2 = vld [vmem:[#allocation7 + $0x18c] ss:$28 sps:$4 sm:$0xff]   ;;  %v1217_v3 = vld [vmem:[#allocation7 + $0x194] ss:$28 sps:$4 sm:$0xff]  }
  0x49   :  { %v1212_v4 = vld [vmem:[#allocation7 + $0x188] ss:$28 sps:$4 sm:$0xff]   ;;  %v1215_v5 = vld [vmem:[#allocation7 + $0x190] ss:$28 sps:$4 sm:$0xff]   ;;  %v975_v8 = vld [vmem:[%s1562_s6] ss:$0 sm:$0xff] }
  0x4a   :  { %1078 = vmatpush3.bf16.msra.mxu0 %v1154_v7  ;;  %1098 = vmatpush3.bf16.msra.mxu1 %v1162_v12  ;;  %v1220_v6 = vld [vmem:[#allocation7 + $0x14] ss:$28 sps:$4 sm:$0xff]   ;;  %v1351_v7 = vmov 0  }
  0x4b   :  { %1079 = vmatprep.subr.bf16.mxu0 %v1349_v0  ;;  %1099 = vmatprep.subr.bf16.mxu1 %v1349_v0 }
  0x4e   :  { %1080 = vmatpush3.bf16.msra.mxu0 %v1155_v9  ;;  %1100 = vmatpush3.bf16.msra.mxu1 %v1163_v14 }
  0x4f   :  { %1081 = vmatprep.subr.bf16.mxu0 %v1349_v0  ;;  %1101 = vmatprep.subr.bf16.mxu1 %v1349_v0 }
  0x52   :  { %1082 = vmatpush3.bf16.msra.mxu0 %v1156_v11  ;;  %1102 = vmatpush3.bf16.msra.mxu1 %v1164_v16  ;;  %v1221_v16 = vld [vmem:[#allocation7 + $0x18] ss:$28 sps:$4 sm:$0xff]  }
  0x53   :  { %1083 = vmatprep.subr.bf16.mxu0 %v1349_v0  ;;  %1103 = vmatprep.subr.bf16.mxu1 %v1349_v0 }
  0x56   :  { %1084 = vmatpush3.bf16.msra.mxu0 %v1157_v13  ;;  %1104 = vmatpush3.bf16.msra.mxu1 %v1165_v17 }
  0x57   :  { %1109 = vmatprep.subr.bf16.mxu0 %v1349_v0  ;;  %771 = vmatprep.subr.bf16.mxu1 %v1172_v31  ;;  %v1238_v31 = vld [vmem:[#allocation7 + $0x128] ss:$28 sps:$4 sm:$0xff]  }
  0x59   :  { %1086 = vmatmul.mubr.bf16.vlgmr.msra.gmra.mrb[0].mxu0 %v71_v15  ;;  %v1218_v15 = vld [vmem:[#allocation7 + $0x10] ss:$28 sps:$4 sm:$0xff]  }
  0x5a   :  { %1117 = vmatprep.mubr.msk.bf16.mxu0 %vm1350_vm0, %v1349_v0  ;;  %1110 = vmatpush3.bf16.msra.mxu0 %v1166_v18  ;;  %v1224_v18 = vld [vmem:[#allocation7 + $0x4c] ss:$28 sps:$4 sm:$0xff]  }
  0x5b   :  { %1111 = vmatprep.subr.bf16.mxu0 %v1349_v0 }
  0x5e   :  { %1112 = vmatpush3.bf16.msra.mxu0 %v1167_v19  ;;  %v1222_v19 = vld [vmem:[#allocation7 + $0x48] ss:$28 sps:$4 sm:$0xff]  }
  0x5f   :  { %1113 = vmatprep.subr.bf16.mxu0 %v1349_v0 }
  0x62   :  { %1114 = vmatpush3.bf16.msra.mxu0 %v1168_v20  ;;  %v1225_v20 = vld [vmem:[#allocation7 + $0x50] ss:$28 sps:$4 sm:$0xff]  }
  0x63   :  { %1115 = vmatprep.subr.bf16.mxu0 %v1349_v0 }
  0x66   :  { %1116 = vmatpush3.bf16.msra.mxu0 %v1169_v29  ;;  %v1237_v29 = vld [vmem:[#allocation7 + $0xf8] ss:$28 sps:$4 sm:$0xff]  }
  0x67   :  { %812 = vmatprep.subr.bf16.mxu0 %v1175_v32  ;;  %v1241_v32 = vld [vmem:[#allocation7 + $0x130] ss:$28 sps:$4 sm:$0xff]  }
 0x12c   :  { %v177_v22 = vpop.f32.mrb[0].mxu0 }
 0x12d   :  { %v178_v23 = vadd.f32 %v957_v21, %v177_v22  ;;  %v1087_v24 = vpop.f32.mrb[1].mxu0  ;;  %v1228_v21 = vld [vmem:[#allocation7 + $0x84] ss:$28 sps:$4 sm:$0xff]  }
 0x12e   :  { %v180_v25 = vpop.f32.mrb[2].mxu0  ;;  %v1226_v22 = vld [vmem:[#allocation7 + $0x80] ss:$28 sps:$4 sm:$0xff]  }
 0x12f   :  { %v183_v26 = vmax.f32 %v178_v23, 0.0  ;;  %v1088_v27 = vpop.f32.mrb[3].mxu0  ;;  %v1229_v23 = vld [vmem:[#allocation7 + $0x88] ss:$28 sps:$4 sm:$0xff]   ;;  %v1232_v24 = vld [vmem:[#allocation7 + $0xbc] ss:$28 sps:$4 sm:$0xff]  }
 0x130   :  { %v1230_v25 = vld [vmem:[#allocation7 + $0xb8] ss:$28 sps:$4 sm:$0xff]  }
 0x131   :  { %v184_v28 = vpack.c.bf16 %v183_v26, %v183_v26  ;;  %v1233_v26 = vld [vmem:[#allocation7 + $0xc0] ss:$28 sps:$4 sm:$0xff]   ;;  %v1236_v27 = vld [vmem:[#allocation7 + $0xf4] ss:$28 sps:$4 sm:$0xff]  }
 0x133   :  { %1106 = vmatmul.mubr.bf16.vlgmr.msra.gmra.mrb[0].mxu1 %v184_v28  ;;  %v1234_v28 = vld [vmem:[#allocation7 + $0xf0] ss:$28 sps:$4 sm:$0xff]  }
 0x134   :  { %772 = vmatpush1.bf16.msra.mxu1 %v1170_v30  ;;  %803 = vmatprep.mubr.bf16.mxu1 %v1351_v7  ;;  %v1240_v30 = vld [vmem:[#allocation7 + $0x12c] ss:$28 sps:$4 sm:$0xff]  }
 0x135   :  { %773 = vmatprep.subr.bf16.mxu1 %v1178_v33  ;;  %v1244_v33 = vld [vmem:[#allocation7 + $0x164] ss:$28 sps:$4 sm:$0xff]  }
 0x138   :  { %774 = vmatpush1.bf16.msra.mxu1 %v1176_v34  ;;  %v1242_v34 = vld [vmem:[#allocation7 + $0x160] ss:$28 sps:$4 sm:$0xff]  }
 0x139   :  { %775 = vmatprep.subr.bf16.mxu1 %v1184_v35  ;;  %v1245_v35 = vld [vmem:[#allocation7 + $0x168] ss:$28 sps:$4 sm:$0xff]  }
 0x13c   :  { %776 = vmatpush1.bf16.msra.mxu1 %v1182_v36  ;;  %v1248_v36 = vld [vmem:[#allocation7 + $0x19c] ss:$28 sps:$4 sm:$0xff]  }
 0x13d   :  { %777 = vmatprep.subr.bf16.mxu1 %v1190_v37  ;;  %v1246_v37 = vld [vmem:[#allocation7 + $0x198] ss:$28 sps:$4 sm:$0xff]  }
 0x140   :  { %778 = vmatpush1.bf16.msra.mxu1 %v1188_v38  ;;  %v1249_v38 = vld [vmem:[#allocation7 + $0x1a0] ss:$28 sps:$4 sm:$0xff]  }
 0x141   :  { %779 = vmatprep.subr.bf16.mxu1 %v1196_v39  ;;  %v448_v39 = vlaneseq }
 0x144   :  { %780 = vmatpush1.bf16.msra.mxu1 %v1194_v40  ;;  %v449_v40 = vshrl.u32 %v448_v39, 7 }
 0x145   :  { %781 = vmatprep.subr.bf16.mxu1 %v1202_v41 }
 0x146   :  { %v450_v41 = vsub.s32 0, %v449_v40 }
 0x148   :  { %782 = vmatpush1.bf16.msra.mxu1 %v1200_v42  ;;  %v458_v42 = vsub.s32 2, %v449_v40 }
 0x149   :  { %783 = vmatprep.subr.bf16.mxu1 %v1208_v43  ;;  %v446_v43 = vld [vmem:[%s1564_s8] sm:$0xff]  ;;  %s1352_s8 = smov [#allocation8]  }
 0x14a   :  { %s947_s20 = sshll.u32 %s1352_s8, 4  ;;  %s948_s20 = int_to_ptr.vmem [resolvable:$true] %s947_s20 }
 0x14b   :  { %s1316_s21 = scalar_lea.vmem %s948_s20, 896  ;;  %p1321_p11 = scmp.lt.s32.totalorder %s948_s20, %s948_s20 }
 0x14c   :  { %784 = vmatpush1.bf16.msra.mxu1 %v1206_v44  ;;  %v454_v44 = vsub.s32 1, %v449_v40  ;;  %p1317_p10 = scmp.ne.s32.totalorder %s948_s20, %s1316_s21  ;;  %p1322_p12 = scmp.lt.s32.totalorder %s1316_s21, %s1316_s21 }
 0x14d   :  { %785 = vmatprep.subr.bf16.mxu1 %v1214_v2 }
 0x14e   :  { %p1323_p13 = por %p1322_p12, %p1321_p11 }
 0x150   :  { %786 = vmatpush1.bf16.msra.mxu1 %v1212_v4  ;;  %p1324_p0 = pnand %p1323_p13, %p1317_p10 }
 0x151   :  { %853 = vmatprep.subr.bf16.mxu1 %v1220_v6 }
 0x206   :  { %v290_v46 = vpop.f32.mrb[0].mxu1 }
 0x207   :  { %v291_v47 = vadd.f32 %v966_v45, %v290_v46  ;;  %v1107_v48 = vpop.f32.mrb[1].mxu1  ;;  %v462_v45 = vsub.s32 3, %v449_v40  ;;  %v451_v46 = vrot.slane %v446_v43, %v450_v41 }
 0x208   :  { %v293_v49 = vpop.f32.mrb[2].mxu1  ;;  %v455_v48 = vrot.slane %v446_v43, %v454_v44 }
 0x209   :  { %v296_v51 = vpack.c.bf16 %v291_v47, %v291_v47  ;;  %v1108_v52 = vpop.f32.mrb[3].mxu1  ;;  %v459_v47 = vrot.slane %v446_v43, %v458_v42  ;;  %v463_v49 = vrot.slane %v446_v43, %v462_v45 }
 0x20b   :  { %1118 = vmatmul.mubr.msk.bf16.vlgmr.msra.gmra.mrb[4].mxu0 %vm336_vm1, %v296_v51 }
 0x20c   :  { %813 = vmatpush1.bf16.msra.mxu0 %v1173_v50  ;;  %844 = vmatprep.mubr.bf16.mxu0 %v1351_v7 }
 0x20d   :  { %814 = vmatprep.subr.bf16.mxu0 %v1181_v53 }
 0x210   :  { %815 = vmatpush1.bf16.msra.mxu0 %v1179_v54 }
 0x211   :  { %816 = vmatprep.subr.bf16.mxu0 %v1187_v55 }
 0x214   :  { %817 = vmatpush1.bf16.msra.mxu0 %v1185_v56 }
 0x215   :  { %818 = vmatprep.subr.bf16.mxu0 %v1193_v57 }
 0x218   :  { %819 = vmatpush1.bf16.msra.mxu0 %v1191_v58 }
 0x219   :  { %820 = vmatprep.subr.bf16.mxu0 %v1199_v59 }
 0x21c   :  { %821 = vmatpush1.bf16.msra.mxu0 %v1197_v60 }
 0x21d   :  { %822 = vmatprep.subr.bf16.mxu0 %v1205_v61  ;;  %v466_v61 = vsub.s32 4, %v449_v40 }
 0x220   :  { %823 = vmatpush1.bf16.msra.mxu0 %v1203_v62  ;;  %v474_v62 = vsub.s32 6, %v449_v40 }
 0x221   :  { %824 = vmatprep.subr.bf16.mxu0 %v1211_v63  ;;  %v470_v63 = vsub.s32 5, %v449_v40 }
 0x222   :  { %v475_v2 = vrot.slane %v446_v43, %v474_v62 }
 0x224   :  { %825 = vmatpush1.bf16.msra.mxu0 %v1209_v1  ;;  %v467_v1 = vrot.slane %v446_v43, %v466_v61 }
 0x225   :  { %826 = vmatprep.subr.bf16.mxu0 %v1217_v3  ;;  %v471_v3 = vrot.slane %v446_v43, %v470_v63 }
 0x228   :  { %827 = vmatpush1.bf16.msra.mxu0 %v1215_v5 }
 0x229   :  { %1121 = vmatprep.subr.bf16.mxu0 %v1349_v0 }
 0x2de   :  { %v374_v9 = vpop.f32.mrb[4].mxu0 }
 0x2df   :  { %v375_v10 = vadd.f32 %v975_v8, %v374_v9  ;;  %v1119_v11 = vpop.f32.mrb[5].mxu0 }
 0x2e0   :  { %v377_v12 = vpop.f32.mrb[6].mxu0 }
 0x2e1   :  { %v380_v13 = vmax.f32 %v375_v10, 0.0  ;;  %v1120_v14 = vpop.f32.mrb[7].mxu0 }
 0x2e3   :  { %v381_v17 = vpack.c.bf16 %v380_v13, %v380_v13 }
 0x2e5   :  { %804 = vmatmul.mubr.bf16.vlgmr.msra.gmra.mrb[4].mxu1 %v381_v17  ;;  %845 = vmatmul.mubr.bf16.vlgmr.msra.gmra.mrb[8].mxu0 %v381_v17 }
 0x2e6   :  { %854 = vmatpush1.bf16.msra.mxu1 %v1218_v15  ;;  %1122 = vmatpush3.bf16.msra.mxu0 %v1221_v16 }
 0x2e7   :  { %855 = vmatprep.subr.bf16.mxu1 %v1224_v18  ;;  %1123 = vmatprep.subr.bf16.mxu0 %v1349_v0 }
 0x2e8   :  { %885 = vmatprep.mubr.bf16.mxu1 %v1351_v7  ;;  %1137 = vmatprep.mubr.msk.bf16.mxu0 %vm1350_vm0, %v1349_v0 }
 0x2ea   :  { %856 = vmatpush1.bf16.msra.mxu1 %v1222_v19  ;;  %1124 = vmatpush3.bf16.msra.mxu0 %v1225_v20 }
 0x2eb   :  { %857 = vmatprep.subr.bf16.mxu1 %v1228_v21  ;;  %1125 = vmatprep.subr.bf16.mxu0 %v1349_v0 }
 0x2ee   :  { %858 = vmatpush1.bf16.msra.mxu1 %v1226_v22  ;;  %1126 = vmatpush3.bf16.msra.mxu0 %v1229_v23 }
 0x2ef   :  { %859 = vmatprep.subr.bf16.mxu1 %v1232_v24  ;;  %1127 = vmatprep.subr.bf16.mxu0 %v1349_v0 }
 0x2f2   :  { %860 = vmatpush1.bf16.msra.mxu1 %v1230_v25  ;;  %1128 = vmatpush3.bf16.msra.mxu0 %v1233_v26 }
 0x2f3   :  { %861 = vmatprep.subr.bf16.mxu1 %v1236_v27  ;;  %1129 = vmatprep.subr.bf16.mxu0 %v1349_v0 }
 0x2f6   :  { %862 = vmatpush1.bf16.msra.mxu1 %v1234_v28  ;;  %1130 = vmatpush3.bf16.msra.mxu0 %v1237_v29 }
 0x2f7   :  { %863 = vmatprep.subr.bf16.mxu1 %v1240_v30  ;;  %1131 = vmatprep.subr.bf16.mxu0 %v1349_v0 }
 0x2fa   :  { %864 = vmatpush1.bf16.msra.mxu1 %v1238_v31  ;;  %1132 = vmatpush3.bf16.msra.mxu0 %v1241_v32 }
 0x2fb   :  { %865 = vmatprep.subr.bf16.mxu1 %v1244_v33  ;;  %1133 = vmatprep.subr.bf16.mxu0 %v1349_v0 }
 0x2fe   :  { %866 = vmatpush1.bf16.msra.mxu1 %v1242_v34  ;;  %1134 = vmatpush3.bf16.msra.mxu0 %v1245_v35 }
 0x2ff   :  { %867 = vmatprep.subr.bf16.mxu1 %v1248_v36  ;;  %1135 = vmatprep.subr.bf16.mxu0 %v1349_v0 }
 0x302   :  { %868 = vmatpush1.bf16.msra.mxu1 %v1246_v37  ;;  %1136 = vmatpush3.bf16.msra.mxu0 %v1249_v38 }
 0x305   :  { %886 = vmatmul.mubr.bf16.vlgmr.msra.gmra.mrb[8].mxu1 %v381_v17  ;;  %1138 = vmatmul.mubr.bf16.vlgmr.msra.gmra.mrb[12].mxu0 %v381_v17 }
 0x3b8   :  { %v805_v50 = vpop.f32.mrb[4].mxu1  ;;  %v846_v0 = vpop.f32.mrb[8].mxu0 }
 0x3b9   :  { %v806_v51 = vadd.f32 %v805_v50, %v451_v46  ;;  %v847_v52 = vadd.f32 %v846_v0, %v459_v47  ;;  %v807_v53 = vpop.f32.mrb[5].mxu1  ;;  %v848_v54 = vpop.f32.mrb[9].mxu0 }
 0x3ba   :  { %v808_v55 = vadd.f32 %v807_v53, %v455_v48  ;;  %v849_v56 = vadd.f32 %v848_v54, %v463_v49  ;;  %v809_v57 = vpop.f32.mrb[6].mxu1  ;;  %v850_v58 = vpop.f32.mrb[10].mxu0 }
 0x3bb   :  { %934 = vst [vmem:[#allocation8] sm:$0xff] %v806_v51  ;;  %936 = vst [vmem:[#allocation8 + $0x10] sm:$0xff] %v847_v52  ;;  %v810_v59 = vpop.f32.mrb[7].mxu1  ;;  %v851_v60 = vpop.f32.mrb[11].mxu0 }
 0x3bc   :  { %935 = vst [vmem:[#allocation8 + $0x8] sm:$0xff] %v808_v55  ;;  %937 = vst [vmem:[#allocation8 + $0x18] sm:$0xff] %v849_v56 }
 0x3d8   :  { %v887_v4 = vpop.f32.mrb[8].mxu1  ;;  %v928_v5 = vpop.f32.mrb[12].mxu0 }
 0x3d9   :  { %v888_v6 = vadd.f32 %v887_v4, %v467_v1  ;;  %v929_v7 = vadd.f32 %v928_v5, %v475_v2  ;;  %v889_v8 = vpop.f32.mrb[9].mxu1  ;;  %v1139_v9 = vpop.f32.mrb[13].mxu0 }
 0x3da   :  { %v890_v10 = vadd.f32 %v889_v8, %v471_v3  ;;  %v891_v11 = vpop.f32.mrb[10].mxu1  ;;  %v931_v12 = vpop.f32.mrb[14].mxu0 }
 0x3db   :  { %938 = vst [vmem:[#allocation8 + $0x20] sm:$0xff] %v888_v6  ;;  %940 = vst [vmem:[#allocation8 + $0x30] sm:$0xff] %v929_v7  ;;  %v892_v13 = vpop.f32.mrb[11].mxu1  ;;  %v1140_v14 = vpop.f32.mrb[15].mxu0 }
 0x3dc   :  { %939 = vst [vmem:[#allocation8 + $0x28] sm:$0xff] %v890_v10 }
 0x3dd   :  { %1327 = shalt.err (!%p1324_p0)
}
 0x3de   :  { %s1328_s12 = scalar_lea.hbm %s1565_s9, 896 }
 0x3df   :  { %p1329_p1 = scmp.ne.s32.totalorder %s1565_s9, %s1328_s12  ;;  %p1332_p2 = scmp.lt.u32.totalorder %s1328_s12, %s1565_s9 }
 0x3e1   :  { %p1334_p3 = pnand %p1332_p2, %p1329_p1 }
 0x3e3   :  { %1337 = shalt.err (!%p1334_p3)
}
 0x3e4   :  { %950 = dma.vmem_to_hbm [thread:$0]  %s948_s20, 896, %s1565_s9, [#allocation4]  }
 0x3e5   :  { %1342 = dma.done.wait [#allocation4], 896  }
 0x3e6   :  { %1343 = vsyncadd [#allocation4], 4294966400 }
 0x3e7   :  { %954 = vsyncpa [#allocation3], 1 }
 0x3e8   :  { %955 = vsyncpa [#allocation6], 1 }
 0x3e9   :  { %956 = vsyncpa [#allocation4], 1 }

</bundles_post_ra>
